<compile_context>
chip_gen: v7x
topology: tpu7x:2x2x1
jax: 0.10.0
libtpu: 0.0.40
codegen_flags: <defaults>
</compile_context>

<pallas_src>
import jax
import jax.numpy as jnp
from jax.experimental import pallas as pl
from jax.experimental.pallas import tpu as pltpu


_LANE = 128          # lane-dense padded class axis (do NOT widen beyond 128)
_NEG_BIG = -1e30     # bias padding so padded classes contribute exactly 0


def _round_up(x, m):
    return ((x + m - 1) // m) * m


def _softmax_linear_kernel(x_ref, wt_ref, b_ref, o_ref):
    # x_ref: (TN, D)   wt_ref: (D, Cp)   b_ref: (1, Cp)   o_ref: (TN, Cp)
    # Canonical (M,K)x(K,N) MXU matmul; f32 accumulation.
    logits = jnp.dot(x_ref[...], wt_ref[...],
                     preferred_element_type=jnp.float32) + b_ref[...]
    # Numerically stable softmax over the lane-dense, padded class axis.
    m = jnp.max(logits, axis=-1, keepdims=True)
    e = jnp.exp(logits - m)
    denom = jnp.sum(e, axis=-1, keepdims=True)
    # Exact divide: the kernel is HBM-bound, so the EUP divide is hidden
    # under the x DMA; approx reciprocal would only cost accuracy.
    o_ref[...] = (e / denom).astype(o_ref.dtype)


def simple_mnist_softmax_forward(x_nchw, weights, biases, *,
                                 tile_n=2048, compute_dtype=None,
                                 return_padded=False):
    """x_nchw: (N, 1, 28, 28).  weights: (10, 784).  biases: (10,)."""
    n = x_nchw.shape[0]
    c, d = weights.shape
    c_pad = _round_up(c, _LANE)   # 10 -> 128

    # Compute dtype follows the input: supply bf16 x from the producer to get
    # the halved-HBM fast path without an extra wrapper cast pass.
    if compute_dtype is None:
        compute_dtype = (jnp.bfloat16 if x_nchw.dtype == jnp.bfloat16
                         else jnp.float32)
    sub = 16 if compute_dtype == jnp.bfloat16 else 8   # sublane packing

    # --- plain-JAX glue: flatten, (maybe) cast, pad batch to sublane -------
    flattened = x_nchw.reshape(n, -1)                  # nn.Flatten(), a view
    if flattened.dtype != compute_dtype:
        # One extra pass only when the caller did not supply compute_dtype x.
        flattened = flattened.astype(compute_dtype)
    n_pad = _round_up(n, sub)
    if n_pad != n:
        flattened = jnp.pad(flattened, ((0, n_pad - n), (0, 0)))

    # Pre-transposed weight (one-time, 392 KiB): MXU RHS is (K, N) = (784,128).
    w_t = jnp.zeros((d, c_pad), compute_dtype).at[:, :c].set(
        weights.T.astype(compute_dtype))
    # Bias always f32 (added to the f32 matmul result); -1e30 padding ->
    # padded-class probabilities underflow to exactly 0.
    b_pad = jnp.full((1, c_pad), _NEG_BIG, jnp.float32).at[0, :c].set(
        biases.astype(jnp.float32))

    # Batch tile: multiple of the sublane; ensure >= 2 grid steps for
    # non-tiny batches so both v7x TensorCores get work.
    tn = min(_round_up(tile_n, sub), n_pad)
    if pl.cdiv(n_pad, tn) < 2 and n_pad >= 2 * sub:
        tn = _round_up(pl.cdiv(n_pad, 2), sub)
    grid = (pl.cdiv(n_pad, tn),)

    x_bytes = jnp.dtype(compute_dtype).itemsize
    cost = pl.CostEstimate(
        flops=2 * n_pad * d * c_pad,
        transcendentals=n_pad * c_pad,
        bytes_accessed=(n_pad * d * x_bytes          # x stream (dominant)
                        + d * c_pad * x_bytes        # W^T (resident)
                        + c_pad * 4                  # bias
                        + n_pad * c_pad * 4))        # output slab

    out_padded = pl.pallas_call(
        _softmax_linear_kernel,
        out_shape=jax.ShapeDtypeStruct((n_pad, c_pad), jnp.float32),
        grid_spec=pltpu.PrefetchScalarGridSpec(
            num_scalar_prefetch=0,
            grid=grid,
            in_specs=[
                pl.BlockSpec((tn, d), lambda i: (i, 0)),      # x : streamed
                pl.BlockSpec((d, c_pad), lambda i: (0, 0)),   # W^T: resident
                pl.BlockSpec((1, c_pad), lambda i: (0, 0)),   # b : resident
            ],
            out_specs=pl.BlockSpec((tn, c_pad), lambda i: (i, 0)),
        ),
        compiler_params=pltpu.CompilerParams(
            dimension_semantics=("parallel",),   # batch axis -> megacore
            vmem_limit_bytes=48 << 20),          # safe on v5e/v6e/v7x
        cost_estimate=cost,
    )(flattened, w_t, b_pad)

    if return_padded:
        # Lane-dense (n, 128) slab; padded classes are exactly 0.  Lets a
        # fused consumer skip the extra [:, :10] HBM pass.
        return out_padded[:n]
    return out_padded[:n, :c]


def _reference(x_nchw, weights, biases):
    n = x_nchw.shape[0]
    flat = x_nchw.reshape(n, -1).astype(jnp.float32)
    logits = flat @ weights.T + biases[None, :]
    return jax.nn.softmax(logits, axis=1)


if __name__ == "__main__":
    key = jax.random.PRNGKey(0)
    k_x, k_w, k_b, k_x2 = jax.random.split(key, 4)

    NUM_CLASSES, H, W = 10, 28, 28
    D = H * W

    # Module parameters stacked: weights{0..9} -> (10, 784); bias{0..9} -> (10,)
    weights = jax.random.normal(k_w, (NUM_CLASSES, D), dtype=jnp.float32) * 0.1
    biases = jax.random.normal(k_b, (NUM_CLASSES,), dtype=jnp.float32) * 0.1

    # --- small batch (N=2), single tile ------------------------------------
    N = 2
    x = jax.random.normal(k_x, (N, 1, H, W), dtype=jnp.float32)
    probs = jax.block_until_ready(simple_mnist_softmax_forward(x, weights, biases))
    ref = _reference(x, weights, biases)
    assert probs.shape == (N, NUM_CLASSES)
    assert jnp.allclose(probs, ref, atol=1e-3, rtol=1e-3), "mismatch (N=2)"
    assert jnp.allclose(jnp.sum(probs, axis=1), 1.0, atol=1e-3)

    # --- multi-tile path: >=2 grid steps, ragged last tile ------------------
    N2, TN2 = 50, 16             # padded to 56 rows -> 4 grid steps
    x2 = jax.random.normal(k_x2, (N2, 1, H, W), dtype=jnp.float32)
    probs2 = jax.block_until_ready(
        simple_mnist_softmax_forward(x2, weights, biases, tile_n=TN2))
    ref2 = _reference(x2, weights, biases)
    assert probs2.shape == (N2, NUM_CLASSES)
    assert jnp.allclose(probs2, ref2, atol=1e-3, rtol=1e-3), "mismatch (N=50)"
    assert jnp.allclose(jnp.sum(probs2, axis=1), 1.0, atol=1e-3)

    # --- bf16 fast path: x supplied in bf16 by the producer -----------------
    probs3 = jax.block_until_ready(
        simple_mnist_softmax_forward(x2.astype(jnp.bfloat16), weights, biases,
                                     tile_n=TN2))
    assert probs3.shape == (N2, NUM_CLASSES)
    assert jnp.allclose(probs3, ref2, atol=2e-2, rtol=2e-2), "mismatch (bf16)"

    print("KERNEL_OK")
</pallas_src>

<mosaic_0001>
module attributes {stable_mosaic.version = 11 : i64} {
  func.func @_softmax_linear_kernel(%arg0: i32, %arg1: memref<8x784xf32, #tpu.memory_space<vmem>>, %arg2: memref<784x128xf32, #tpu.memory_space<vmem>>, %arg3: memref<1x128xf32, #tpu.memory_space<vmem>>, %arg4: memref<8x128xf32, #tpu.memory_space<vmem>>) attributes {dimension_semantics = [#tpu.dimension_semantics<parallel>], iteration_bounds = array<i64: 1>, scalar_prefetch = 0 : i64, scratch_operands = 0 : i64, tpu.core_type = #tpu.core_type<tc>, window_params = [{transform_indices = @transform_0, window_bounds = array<i64: 8, 784>}, {pipeline_mode = #tpu.pipeline_mode<synchronous>, transform_indices = @transform_1, window_bounds = array<i64: 784, 128>}, {pipeline_mode = #tpu.pipeline_mode<synchronous>, transform_indices = @transform_2, window_bounds = array<i64: 1, 128>}, {transform_indices = @transform_3, window_bounds = array<i64: 8, 128>}]} {
    %c0 = arith.constant 0 : index
    %c0_0 = arith.constant 0 : index
    %0 = vector.load %arg1[%c0, %c0_0] : memref<8x784xf32, #tpu.memory_space<vmem>>, vector<8x784xf32>
    %c0_1 = arith.constant 0 : index
    %c0_2 = arith.constant 0 : index
    %1 = vector.load %arg2[%c0_1, %c0_2] : memref<784x128xf32, #tpu.memory_space<vmem>>, vector<784x128xf32>
    %cst = arith.constant dense<0.000000e+00> : vector<8x128xf32>
    %2 = tpu.matmul %0, %1, %cst {dimension_numbers = #tpu.dot_dimension_numbers<[1], [0], [0], [1], [0, 0, 1, 1], [], []>} : vector<8x784xf32>, vector<784x128xf32>, vector<8x128xf32> -> vector<8x128xf32>
    %c0_3 = arith.constant 0 : index
    %c0_4 = arith.constant 0 : index
    %3 = vector.load %arg3[%c0_3, %c0_4] : memref<1x128xf32, #tpu.memory_space<vmem>>, vector<1x128xf32>
    %4 = vector.broadcast %3 : vector<1x128xf32> to vector<8x128xf32>
    %5 = arith.addf %2, %4 : vector<8x128xf32>
    %cst_5 = arith.constant dense<0xFF800000> : vector<8xf32>
    %6 = vector.multi_reduction <maximumf>, %5, %cst_5 [1] : vector<8x128xf32> to vector<8xf32>
    %7 = vector.shape_cast %6 : vector<8xf32> to vector<8x1xf32>
    %8 = vector.broadcast %7 : vector<8x1xf32> to vector<8x128xf32>
    %9 = arith.subf %5, %8 : vector<8x128xf32>
    %10 = math.exp %9 : vector<8x128xf32>
    %cst_6 = arith.constant dense<0.000000e+00> : vector<8xf32>
    %11 = vector.multi_reduction <add>, %10, %cst_6 [1] : vector<8x128xf32> to vector<8xf32>
    %12 = vector.shape_cast %11 : vector<8xf32> to vector<8x1xf32>
    %13 = vector.broadcast %12 : vector<8x1xf32> to vector<8x128xf32>
    %14 = arith.divf %10, %13 : vector<8x128xf32>
    %c0_7 = arith.constant 0 : index
    %c0_8 = arith.constant 0 : index
    %15 = vector.load %arg4[%c0_7, %c0_8] : memref<8x128xf32, #tpu.memory_space<vmem>>, vector<8x128xf32>
    tpu.vector_store %arg4[%c0_7, %c0_8], %14 {strides = array<i32>} : memref<8x128xf32, #tpu.memory_space<vmem>>, vector<8x128xf32>,
    return
  }
  func.func @transform_0(%arg0: i32) -> (i32, i32) {
    %c0_i32 = arith.constant 0 : i32
    %c0_i32_0 = arith.constant 0 : i32
    return %arg0, %c0_i32 : i32, i32
  }
  func.func @transform_1(%arg0: i32) -> (i32, i32) {
    %c0_i32 = arith.constant 0 : i32
    %c0_i32_0 = arith.constant 0 : i32
    %c0_i32_1 = arith.constant 0 : i32
    return %c0_i32, %c0_i32_0 : i32, i32
  }
  func.func @transform_2(%arg0: i32) -> (i32, i32) {
    %c0_i32 = arith.constant 0 : i32
    %c0_i32_0 = arith.constant 0 : i32
    %c0_i32_1 = arith.constant 0 : i32
    return %c0_i32, %c0_i32_0 : i32, i32
  }
  func.func @transform_3(%arg0: i32) -> (i32, i32) {
    %c0_i32 = arith.constant 0 : i32
    %c0_i32_0 = arith.constant 0 : i32
    return %arg0, %c0_i32 : i32, i32
  }
}

</mosaic_0001>

<bundles_post_ra>
// kernel: tpu_custom_call.1
= control target key start
LH: loop header
LB: loop body
LE: loop exit
PB: predicated region body
PF: predicated region fallthrough
CT: control target
= control target key end

     0   :  { %8 = vsyncpa [#allocation3], 0  ;;  %s837_s0 = inlined_call_operand.hbm [shape: f32[8,784], index: 0, kind: input, shape index: {}]   ;;  %s838_s1 = inlined_call_operand.hbm [shape: f32[784,128], index: 1, kind: input, shape index: {}]   ;;  %s839_s2 = inlined_call_operand.vmem [shape: f32[1,128], index: 2, kind: input, shape index: {}]   ;;  %s840_s3 = inlined_call_operand.hbm [shape: f32[8,128], index: 3, kind: output, shape index: {}]  }
   0x1   :  { %9 = vsyncpa [#allocation6], 0 }
   0x2   :  { %10 = vsyncpa [#allocation4], 0  ;;  %s763_s12 = smov [#allocation2]   ;;  %s764_s14 = smov [#allocation5]  }
   0x3   :  { %s17_s13 = sshll.u32 %s763_s12, 4  ;;  %s26_s15 = sshll.u32 %s764_s14, 4  ;;  %s18_s13 = int_to_ptr.vmem [resolvable:$true] %s17_s13  ;;  %s791_s15 = int_to_ptr.vmem [resolvable:$true] %s26_s15 }
   0x4   :  { %s691_s18 = scalar_lea.hbm %s837_s0, 896 }
   0x5   :  { %p692_p0 = scmp.ne.s32.totalorder %s837_s0, %s691_s18  ;;  %p695_p1 = scmp.lt.u32.totalorder %s691_s18, %s837_s0 }
   0x7   :  { %p697_p2 = pnand %p695_p1, %p692_p0 }
   0x9   :  { %700 = shalt.err (!%p697_p2)
}
   0xa   :  { %s701_s23 = scalar_lea.vmem %s18_s13, 896  ;;  %p706_p4 = scmp.lt.s32.totalorder %s18_s13, %s18_s13 }
   0xb   :  { %p702_p3 = scmp.ne.s32.totalorder %s18_s13, %s701_s23  ;;  %p707_p5 = scmp.lt.s32.totalorder %s701_s23, %s701_s23 }
   0xd   :  { %p708_p6 = por %p707_p5, %p706_p4 }
   0xf   :  { %p709_p7 = pnand %p708_p6, %p702_p3 }
  0x11   :  { %712 = shalt.err (!%p709_p7)
}
  0x12   :  { %20 = dma.hbm_to_vmem [thread:$0]  %s837_s0, 896, %s18_s13, [#allocation3]  }
  0x13   :  { %s713_s28 = scalar_lea.hbm %s838_s1, 12544 }
  0x14   :  { %p714_p8 = scmp.ne.s32.totalorder %s838_s1, %s713_s28  ;;  %p717_p9 = scmp.lt.u32.totalorder %s713_s28, %s838_s1 }
  0x16   :  { %p719_p10 = pnand %p717_p9, %p714_p8 }
  0x18   :  { %722 = shalt.err (!%p719_p10)
}
  0x19   :  { %s723_s6 = scalar_lea.vmem %s791_s15, 12544  ;;  %p728_p12 = scmp.lt.s32.totalorder %s791_s15, %s791_s15 }
  0x1a   :  { %p724_p11 = scmp.ne.s32.totalorder %s791_s15, %s723_s6  ;;  %p729_p13 = scmp.lt.s32.totalorder %s723_s6, %s723_s6 }
  0x1c   :  { %p730_p0 = por %p729_p13, %p728_p12 }
  0x1e   :  { %p731_p1 = pnand %p730_p0, %p724_p11 }
  0x20   :  { %734 = shalt.err (!%p731_p1)
}
  0x21   :  { %s765_s0 = smov 128   ;;  %s766_s7 = smov 8  }
  0x22   :  { %32 = dma.hbm_to_vmem [thread:$0]  %s838_s1, 12544, %s791_s15, [#allocation6], %s765_s0, %s765_s0, %s766_s7  }
  0x23   :  { %757 = dma.done.wait [#allocation3], 896  }
  0x24   :  { %758 = vsyncadd [#allocation3], 4294966400 }
  0x25   :  { %759 = dma.done.wait [#allocation6], 12544  }
  0x26   :  { %760 = vsyncadd [#allocation6], 4294954752  ;;  %v64_v0 = vld [vmem:[#allocation5 + $0x80] sm:$0xff]  ;;  %v65_v1 = vld [vmem:[#allocation5 + $0x88] sm:$0xff]  ;;  %vm768_vm0 = vmmov 0   ;;  %vm153_vm1 = vcmask 130048  }
  0x27   :  { %v48_v2 = vld [vmem:[#allocation5] sm:$0xff]  ;;  %v580_v3 = vpack.c.bf16 %v65_v1, %v64_v0  ;;  %v49_v4 = vld [vmem:[#allocation5 + $0x8] sm:$0xff]  ;;  %v66_v11 = vld [vmem:[#allocation5 + $0x90] sm:$0xff] }
  0x28   :  { %v96_v5 = vld [vmem:[#allocation5 + $0x180] sm:$0xff]  ;;  %v97_v6 = vld [vmem:[#allocation5 + $0x188] sm:$0xff]  ;;  %v582_v7 = vpack.c.bf16 %v49_v4, %v48_v2  ;;  %v67_v13 = vld [vmem:[#allocation5 + $0x98] sm:$0xff] }
  0x29   :  { %v612_v8 = vpack.c.bf16 %v97_v6, %v96_v5  ;;  %v80_v9 = vld [vmem:[#allocation5 + $0x100] sm:$0xff]  ;;  %v81_v10 = vld [vmem:[#allocation5 + $0x108] sm:$0xff]  ;;  %581 = vmatprep.subr.bf16.mxu0 %v580_v3  ;;  %v50_v14 = vld [vmem:[#allocation5 + $0x10] sm:$0xff]  ;;  %v584_v16 = vpack.c.bf16 %v67_v13, %v66_v11 }
  0x2a   :  { %v614_v12 = vpack.c.bf16 %v81_v10, %v80_v9  ;;  %v51_v15 = vld [vmem:[#allocation5 + $0x18] sm:$0xff]  ;;  %583 = vmatpush3.bf16.msra.mxu0 %v582_v7  ;;  %v98_v18 = vld [vmem:[#allocation5 + $0x190] sm:$0xff]  ;;  %v68_v23 = vld [vmem:[#allocation5 + $0xa0] sm:$0xff] }
  0x2b   :  { %613 = vmatprep.subr.bf16.mxu1 %v612_v8  ;;  %v586_v17 = vpack.c.bf16 %v51_v15, %v50_v14  ;;  %v99_v19 = vld [vmem:[#allocation5 + $0x198] sm:$0xff]  ;;  %v82_v20 = vld [vmem:[#allocation5 + $0x110] sm:$0xff]  ;;  %v69_v24 = vld [vmem:[#allocation5 + $0xa8] sm:$0xff]  ;;  %585 = vmatprep.subr.bf16.mxu0 %v584_v16 }
  0x2c   :  { %615 = vmatpush3.bf16.msra.mxu1 %v614_v12  ;;  %v616_v21 = vpack.c.bf16 %v99_v19, %v98_v18  ;;  %v83_v22 = vld [vmem:[#allocation5 + $0x118] sm:$0xff]  ;;  %v588_v26 = vpack.c.bf16 %v69_v24, %v68_v23  ;;  %v52_v27 = vld [vmem:[#allocation5 + $0x20] sm:$0xff]  ;;  %v53_v28 = vld [vmem:[#allocation5 + $0x28] sm:$0xff] }
  0x2d   :  { %v618_v25 = vpack.c.bf16 %v83_v22, %v82_v20  ;;  %v100_v29 = vld [vmem:[#allocation5 + $0x1a0] sm:$0xff]  ;;  %v101_v30 = vld [vmem:[#allocation5 + $0x1a8] sm:$0xff]  ;;  %v590_v33 = vpack.c.bf16 %v53_v28, %v52_v27  ;;  %v70_v35 = vld [vmem:[#allocation5 + $0xb0] sm:$0xff] }
  0x2e   :  { %617 = vmatprep.subr.bf16.mxu1 %v616_v21  ;;  %v84_v31 = vld [vmem:[#allocation5 + $0x120] sm:$0xff]  ;;  %v85_v32 = vld [vmem:[#allocation5 + $0x128] sm:$0xff]  ;;  %587 = vmatpush3.bf16.msra.mxu0 %v586_v17  ;;  %v620_v34 = vpack.c.bf16 %v101_v30, %v100_v29  ;;  %v71_v36 = vld [vmem:[#allocation5 + $0xb8] sm:$0xff] }
  0x2f   :  { %v54_v37 = vld [vmem:[#allocation5 + $0x30] sm:$0xff]  ;;  %589 = vmatprep.subr.bf16.mxu0 %v588_v26  ;;  %v622_v38 = vpack.c.bf16 %v85_v32, %v84_v31  ;;  %v592_v39 = vpack.c.bf16 %v71_v36, %v70_v35  ;;  %v55_v40 = vld [vmem:[#allocation5 + $0x38] sm:$0xff]  ;;  %v72_v46 = vld [vmem:[#allocation5 + $0xc0] sm:$0xff] }
  0x30   :  { %619 = vmatpush3.bf16.msra.mxu1 %v618_v25  ;;  %v102_v41 = vld [vmem:[#allocation5 + $0x1b0] sm:$0xff]  ;;  %v103_v42 = vld [vmem:[#allocation5 + $0x1b8] sm:$0xff]  ;;  %v73_v47 = vld [vmem:[#allocation5 + $0xc8] sm:$0xff]  ;;  %v594_v48 = vpack.c.bf16 %v55_v40, %v54_v37 }
  0x31   :  { %621 = vmatprep.subr.bf16.mxu1 %v620_v34  ;;  %v624_v43 = vpack.c.bf16 %v103_v42, %v102_v41  ;;  %v86_v44 = vld [vmem:[#allocation5 + $0x130] sm:$0xff]  ;;  %v87_v45 = vld [vmem:[#allocation5 + $0x138] sm:$0xff]  ;;  %v104_v49 = vld [vmem:[#allocation5 + $0x1c0] sm:$0xff]  ;;  %v596_v52 = vpack.c.bf16 %v73_v47, %v72_v46 }
  0x32   :  { %591 = vmatpush3.bf16.msra.mxu0 %v590_v33  ;;  %v105_v50 = vld [vmem:[#allocation5 + $0x1c8] sm:$0xff]  ;;  %v626_v51 = vpack.c.bf16 %v87_v45, %v86_v44  ;;  %v56_v53 = vld [vmem:[#allocation5 + $0x40] sm:$0xff]  ;;  %v74_v58 = vld [vmem:[#allocation5 + $0xd0] sm:$0xff] }
  0x33   :  { %593 = vmatprep.subr.bf16.mxu0 %v592_v39  ;;  %v57_v54 = vld [vmem:[#allocation5 + $0x48] sm:$0xff]  ;;  %v88_v55 = vld [vmem:[#allocation5 + $0x140] sm:$0xff]  ;;  %v628_v56 = vpack.c.bf16 %v105_v50, %v104_v49  ;;  %v75_v59 = vld [vmem:[#allocation5 + $0xd8] sm:$0xff]  ;;  %v767_v50 = vmov 0.0|0.0  }
  0x34   :  { %623 = vmatpush3.bf16.msra.mxu1 %v622_v38  ;;  %v89_v57 = vld [vmem:[#allocation5 + $0x148] sm:$0xff]  ;;  %v106_v60 = vld [vmem:[#allocation5 + $0x1d0] sm:$0xff]  ;;  %v107_v61 = vld [vmem:[#allocation5 + $0x1d8] sm:$0xff]  ;;  %v598_v62 = vpack.c.bf16 %v57_v54, %v56_v53  ;;  %v600_v0 = vpack.c.bf16 %v75_v59, %v74_v58 }
  0x35   :  { %625 = vmatprep.subr.bf16.mxu1 %v624_v43  ;;  %v630_v63 = vpack.c.bf16 %v89_v57, %v88_v55  ;;  %v58_v1 = vld [vmem:[#allocation5 + $0x50] sm:$0xff]  ;;  %v59_v2 = vld [vmem:[#allocation5 + $0x58] sm:$0xff]  ;;  %v632_v4 = vpack.c.bf16 %v107_v61, %v106_v60  ;;  %v76_v6 = vld [vmem:[#allocation5 + $0xe0] sm:$0xff]  ;;  %v769_v60 = vmov 0.0  }
  0x36   :  { %595 = vmatpush3.bf16.msra.mxu0 %v594_v48  ;;  %v90_v3 = vld [vmem:[#allocation5 + $0x150] sm:$0xff]  ;;  %v91_v5 = vld [vmem:[#allocation5 + $0x158] sm:$0xff]  ;;  %v77_v7 = vld [vmem:[#allocation5 + $0xe8] sm:$0xff]  ;;  %v602_v10 = vpack.c.bf16 %v59_v2, %v58_v1 }
  0x37   :  { %597 = vmatprep.subr.bf16.mxu0 %v596_v52  ;;  %v108_v8 = vld [vmem:[#allocation5 + $0x1e0] sm:$0xff]  ;;  %v109_v9 = vld [vmem:[#allocation5 + $0x1e8] sm:$0xff]  ;;  %v42_v12 = vld [vmem:[#allocation2 + $0x8] sm:$0xff]  ;;  %v634_v13 = vpack.c.bf16 %v91_v5, %v90_v3  ;;  %v604_v14 = vpack.c.bf16 %v77_v7, %v76_v6 }
  0x38   :  { %627 = vmatpush3.bf16.msra.mxu1 %v626_v51  ;;  %v60_v11 = vld [vmem:[#allocation5 + $0x60] sm:$0xff]  ;;  %v61_v15 = vld [vmem:[#allocation5 + $0x68] sm:$0xff]  ;;  %v636_v18 = vpack.c.bf16 %v109_v9, %v108_v8  ;;  %v78_v19 = vld [vmem:[#allocation5 + $0xf0] sm:$0xff]  ;;  %221 = vmatprep.mubr.f32.mxu0 %v42_v12 }
  0x39   :  { %629 = vmatprep.subr.bf16.mxu1 %v628_v56  ;;  %v92_v16 = vld [vmem:[#allocation5 + $0x160] sm:$0xff]  ;;  %v93_v17 = vld [vmem:[#allocation5 + $0x168] sm:$0xff]  ;;  %v79_v20 = vld [vmem:[#allocation5 + $0xf8] sm:$0xff]  ;;  %v606_v24 = vpack.c.bf16 %v61_v15, %v60_v11 }
  0x3a   :  { %599 = vmatpush3.bf16.msra.mxu0 %v598_v62  ;;  %v44_v21 = vld [vmem:[#allocation2 + $0x18] sm:$0xff]  ;;  %v110_v22 = vld [vmem:[#allocation5 + $0x1f0] sm:$0xff]  ;;  %v111_v23 = vld [vmem:[#allocation5 + $0x1f8] sm:$0xff]  ;;  %v638_v25 = vpack.c.bf16 %v93_v17, %v92_v16  ;;  %v608_v26 = vpack.c.bf16 %v79_v20, %v78_v19 }
  0x3b   :  { %601 = vmatprep.subr.bf16.mxu0 %v600_v0  ;;  %291 = vmatprep.mubr.f32.mxu1 %v44_v21  ;;  %v62_v27 = vld [vmem:[#allocation5 + $0x70] sm:$0xff]  ;;  %v63_v28 = vld [vmem:[#allocation5 + $0x78] sm:$0xff]  ;;  %v640_v30 = vpack.c.bf16 %v111_v23, %v110_v22  ;;  %v128_v32 = vld [vmem:[#allocation5 + $0x280] sm:$0xff] }
  0x3c   :  { %631 = vmatpush3.bf16.msra.mxu1 %v630_v63  ;;  %v94_v29 = vld [vmem:[#allocation5 + $0x170] sm:$0xff]  ;;  %v95_v31 = vld [vmem:[#allocation5 + $0x178] sm:$0xff]  ;;  %v129_v33 = vld [vmem:[#allocation5 + $0x288] sm:$0xff]  ;;  %v610_v34 = vpack.c.bf16 %v63_v28, %v62_v27 }
  0x3d   :  { %633 = vmatprep.subr.bf16.mxu1 %v632_v4  ;;  %v642_v35 = vpack.c.bf16 %v95_v31, %v94_v29  ;;  %v644_v36 = vpack.c.bf16 %v129_v33, %v128_v32  ;;  %v112_v37 = vld [vmem:[#allocation5 + $0x200] sm:$0xff]  ;;  %v113_v38 = vld [vmem:[#allocation5 + $0x208] sm:$0xff]  ;;  %v130_v39 = vld [vmem:[#allocation5 + $0x290] sm:$0xff] }
  0x3e   :  { %603 = vmatpush3.bf16.msra.mxu0 %v602_v10  ;;  %v131_v40 = vld [vmem:[#allocation5 + $0x298] sm:$0xff]  ;;  %v41_v41 = vld [vmem:[#allocation2] sm:$0xff]  ;;  %v646_v42 = vpack.c.bf16 %v113_v38, %v112_v37  ;;  %v114_v44 = vld [vmem:[#allocation5 + $0x210] sm:$0xff] }
  0x3f   :  { %605 = vmatprep.subr.bf16.mxu0 %v604_v14  ;;  %v43_v43 = vld [vmem:[#allocation2 + $0x10] sm:$0xff]  ;;  %v648_v45 = vpack.c.bf16 %v131_v40, %v130_v39  ;;  %v132_v47 = vld [vmem:[#allocation5 + $0x2a0] sm:$0xff]  ;;  %v133_v48 = vld [vmem:[#allocation5 + $0x2a8] sm:$0xff] }
  0x40   :  { %635 = vmatpush3.bf16.msra.mxu1 %v634_v13  ;;  %v115_v46 = vld [vmem:[#allocation5 + $0x218] sm:$0xff]  ;;  %v46_v49 = vld [vmem:[#allocation2 + $0x28] sm:$0xff]  ;;  %v144_v51 = vld [vmem:[#allocation5 + $0x300] sm:$0xff]  ;;  %v652_v55 = vpack.c.bf16 %v133_v48, %v132_v47 }
  0x41   :  { %637 = vmatprep.subr.bf16.mxu1 %v636_v18  ;;  %v145_v52 = vld [vmem:[#allocation5 + $0x308] sm:$0xff]  ;;  %v650_v54 = vpack.c.bf16 %v115_v46, %v114_v44  ;;  %v116_v56 = vld [vmem:[#allocation5 + $0x220] sm:$0xff]  ;;  %v134_v58 = vld [vmem:[#allocation5 + $0x2b0] sm:$0xff] }
  0x42   :  { %607 = vmatpush3.bf16.msra.mxu0 %v606_v24  ;;  %v677_v53 = vpack.c.bf16 %v145_v52, %v144_v51  ;;  %v117_v57 = vld [vmem:[#allocation5 + $0x228] sm:$0xff]  ;;  %v135_v59 = vld [vmem:[#allocation5 + $0x2b8] sm:$0xff]  ;;  %v118_v0 = vld [vmem:[#allocation5 + $0x230] sm:$0xff] }
  0x43   :  { %609 = vmatprep.subr.bf16.mxu0 %v608_v26  ;;  %v47_v61 = vld [vmem:[#allocation2 + $0x30] sm:$0xff]  ;;  %v654_v62 = vpack.c.bf16 %v117_v57, %v116_v56  ;;  %v656_v63 = vpack.c.bf16 %v135_v59, %v134_v58  ;;  %v136_v2 = vld [vmem:[#allocation5 + $0x2c0] sm:$0xff]  ;;  %v137_v3 = vld [vmem:[#allocation5 + $0x2c8] sm:$0xff] }
  0x44   :  { %639 = vmatpush3.bf16.msra.mxu1 %v638_v25  ;;  %v119_v1 = vld [vmem:[#allocation5 + $0x238] sm:$0xff]  ;;  %v660_v5 = vpack.c.bf16 %v137_v3, %v136_v2  ;;  %v120_v6 = vld [vmem:[#allocation5 + $0x240] sm:$0xff]  ;;  %v121_v7 = vld [vmem:[#allocation5 + $0x248] sm:$0xff] }
  0x45   :  { %641 = vmatprep.subr.bf16.mxu1 %v640_v30  ;;  %v658_v4 = vpack.c.bf16 %v119_v1, %v118_v0  ;;  %v138_v8 = vld [vmem:[#allocation5 + $0x2d0] sm:$0xff]  ;;  %v139_v9 = vld [vmem:[#allocation5 + $0x2d8] sm:$0xff]  ;;  %v662_v10 = vpack.c.bf16 %v121_v7, %v120_v6  ;;  %v140_v14 = vld [vmem:[#allocation5 + $0x2e0] sm:$0xff] }
  0x46   :  { %611 = vmatpush3.bf16.msra.mxu0 %v610_v34  ;;  %v664_v11 = vpack.c.bf16 %v139_v9, %v138_v8  ;;  %v122_v12 = vld [vmem:[#allocation5 + $0x250] sm:$0xff]  ;;  %v123_v13 = vld [vmem:[#allocation5 + $0x258] sm:$0xff]  ;;  %v141_v15 = vld [vmem:[#allocation5 + $0x2e8] sm:$0xff] }
  0x47   :  { %645 = vmatprep.subr.bf16.mxu0 %v644_v36  ;;  %v666_v16 = vpack.c.bf16 %v123_v13, %v122_v12  ;;  %v668_v17 = vpack.c.bf16 %v141_v15, %v140_v14  ;;  %v124_v18 = vld [vmem:[#allocation5 + $0x260] sm:$0xff]  ;;  %v125_v19 = vld [vmem:[#allocation5 + $0x268] sm:$0xff]  ;;  %v142_v20 = vld [vmem:[#allocation5 + $0x2f0] sm:$0xff] }
  0x48   :  { %643 = vmatpush3.bf16.msra.mxu1 %v642_v35  ;;  %v143_v21 = vld [vmem:[#allocation5 + $0x2f8] sm:$0xff]  ;;  %v670_v22 = vpack.c.bf16 %v125_v19, %v124_v18  ;;  %v126_v24 = vld [vmem:[#allocation5 + $0x270] sm:$0xff]  ;;  %v45_v27 = vld [vmem:[#allocation2 + $0x20] sm:$0xff] }
  0x49   :  { %676 = vmatprep.subr.bf16.mxu1 %v767_v50  ;;  %222 = vmatmul.mubr.f32.vlgmr.msra.gmra.mrb[0].mxu0 %v41_v41  ;;  %v672_v23 = vpack.c.bf16 %v143_v21, %v142_v20  ;;  %v127_v25 = vld [vmem:[#allocation5 + $0x278] sm:$0xff]  ;;  %v463_v29 = vld [vmem:[%s839_s2] ss:$0 sm:$0xff]  ;;  %s770_s2 = smov [#allocation7]  }
  0x4a   :  { %647 = vmatpush3.bf16.msra.mxu0 %v646_v42  ;;  %361 = vmatprep.mubr.f32.mxu0 %v46_v49  ;;  %v674_v26 = vpack.c.bf16 %v127_v25, %v126_v24  ;;  %s453_s11 = sshll.u32 %s770_s2, 4  ;;  %s454_s11 = int_to_ptr.vmem [resolvable:$true] %s453_s11 }
  0x4b   :  { %292 = vmatmul.mubr.f32.vlgmr.msra.gmra.mrb[0].mxu1 %v43_v43  ;;  %649 = vmatprep.subr.bf16.mxu0 %v648_v45  ;;  %s735_s12 = scalar_lea.vmem %s454_s11, 128  ;;  %p740_p3 = scmp.lt.s32.totalorder %s454_s11, %s454_s11 }
  0x4c   :  { %678 = vmatpush3.bf16.msra.mxu1 %v677_v53  ;;  %577 = vmatprep.mubr.msk.f32.mxu1 %vm768_vm0, %v769_v60  ;;  %p736_p2 = scmp.ne.s32.totalorder %s454_s11, %s735_s12  ;;  %p741_p4 = scmp.lt.s32.totalorder %s735_s12, %s735_s12 }
  0x4e   :  { %651 = vmatpush3.bf16.msra.mxu0 %v650_v54  ;;  %p742_p5 = por %p741_p4, %p740_p3 }
  0x4f   :  { %653 = vmatprep.subr.bf16.mxu0 %v652_v55  ;;  %578 = vmatmul.mubr.msk.f32.vlgmr.msra.gmra.mrb[2].mxu1 %vm153_vm1, %v47_v61 }
  0x50   :  { %p743_p6 = pnand %p742_p5, %p736_p2 }
  0x52   :  { %655 = vmatpush3.bf16.msra.mxu0 %v654_v62 }
  0x53   :  { %657 = vmatprep.subr.bf16.mxu0 %v656_v63 }
  0x56   :  { %659 = vmatpush3.bf16.msra.mxu0 %v658_v4 }
  0x57   :  { %661 = vmatprep.subr.bf16.mxu0 %v660_v5 }
  0x5a   :  { %663 = vmatpush3.bf16.msra.mxu0 %v662_v10 }
  0x5b   :  { %665 = vmatprep.subr.bf16.mxu0 %v664_v11 }
  0x5e   :  { %667 = vmatpush3.bf16.msra.mxu0 %v666_v16 }
  0x5f   :  { %669 = vmatprep.subr.bf16.mxu0 %v668_v17 }
  0x62   :  { %671 = vmatpush3.bf16.msra.mxu0 %v670_v22 }
  0x63   :  { %673 = vmatprep.subr.bf16.mxu0 %v672_v23 }
  0x66   :  { %675 = vmatpush3.bf16.msra.mxu0 %v674_v26 }
  0x69   :  { %362 = vmatmul.mubr.f32.vlgmr.msra.gmra.mrb[2].mxu0 %v45_v27 }
 0x11c   :  { %v497_v28 = vpop.f32.mrb[0].mxu0 }
 0x11d   :  { %v498_v30 = vpop.f32.mrb[1].mxu0 }
 0x11e   :  { %v532_v31 = vpop.f32.mrb[0].mxu1  ;;  %v499_v32 = vadd.f32 %v498_v30, %v497_v28 }
 0x11f   :  { %v533_v33 = vpop.f32.mrb[1].mxu1 }
 0x120   :  { %v534_v34 = vadd.f32 %v533_v33, %v532_v31  ;;  %v224_v35 = vadd.f32 %v499_v32, %v463_v29 }
 0x122   :  { %v294_v36 = vadd.f32 %v534_v34, %v224_v35  ;;  %v433_v37 = vpop.f32.mrb[2].mxu1 }
 0x123   :  { %v579_v38 = vpop.f32.mrb[3].mxu1 }
 0x13c   :  { %v567_v39 = vpop.f32.mrb[2].mxu0 }
 0x13d   :  { %v568_v40 = vpop.f32.mrb[3].mxu0 }
 0x13e   :  { %v569_v41 = vadd.f32 %v568_v40, %v567_v39 }
 0x140   :  { %v364_v42 = vadd.f32 %v569_v41, %v294_v36 }
 0x142   :  { %v434_v43 = vadd.f32 %v433_v37, %v364_v42 }
 0x144   :  { %437 = vmax.xlane.f32.xlu0 %v434_v43 }
 0x1d1   :  { %v438_v44 = vpop.xlane.xlu0 %437 }
 0x1d2   :  { %v439_v45 = vsub.f32 %v434_v43, %v438_v44 }
 0x1d4   :  { %v440_v46 = vmul.f32 1.442695, %v439_v45 }
 0x1d6   :  { %687 = vpow2.f32 %v440_v46 }
 0x1e0   :  { %v688_v47 = vpop.eup %687 }
 0x1e1   :  { %442 = vadd.xlane.f32.xlu0 %v688_v47 }
 0x26e   :  { %v443_v48 = vpop.xlane.xlu0 %442 }
 0x26f   :  { %689 = vrcp.f32 %v443_v48 }
 0x279   :  { %v690_v49 = vpop.eup %689 }
 0x27a   :  { %v445_v50 = vmul.f32 %v690_v49, %v688_v47 }
 0x27c   :  { %446 = vst [vmem:[#allocation7] sm:$0xff] %v445_v50 }
 0x27d   :  { %746 = shalt.err (!%p743_p6)
}
 0x27e   :  { %s747_s15 = scalar_lea.hbm %s840_s3, 128 }
 0x27f   :  { %p748_p7 = scmp.ne.s32.totalorder %s840_s3, %s747_s15  ;;  %p751_p8 = scmp.lt.u32.totalorder %s747_s15, %s840_s3 }
 0x281   :  { %p753_p9 = pnand %p751_p8, %p748_p7 }
 0x283   :  { %756 = shalt.err (!%p753_p9)
}
 0x284   :  { %456 = dma.vmem_to_hbm [thread:$0]  %s454_s11, 128, %s840_s3, [#allocation4]  }
 0x285   :  { %761 = dma.done.wait [#allocation4], 128  }
 0x286   :  { %762 = vsyncadd [#allocation4], 4294967168 }
 0x287   :  { %460 = vsyncpa [#allocation3], 1 }
 0x288   :  { %461 = vsyncpa [#allocation6], 1 }
 0x289   :  { %462 = vsyncpa [#allocation4], 1 }

</bundles_post_ra>
